<compile_context>
chip_gen: v7x
topology: tpu7x:2x2x1
jax: 0.10.0
libtpu: 0.0.40
codegen_flags: <defaults>
</compile_context>

<pallas_src>
import functools

import jax
import jax.numpy as jnp
import numpy as np
from jax import lax
from jax.experimental import pallas as pl
from jax.experimental.pallas import tpu as pltpu


def _round_up(x, m):
    return ((x + m - 1) // m) * m


def _cdiv(a, b):
    return -(-a // b)


def _sigmoid(v):
    # Reference-path sigmoid (matches torch.sigmoid literally).
    return 1.0 / (1.0 + jnp.exp(-v))


def _silu(v):
    # silu(v) = v * sigmoid(v), with sigmoid(v) = 0.5*(1 + tanh(v/2)).
    # tanh lowers to the EUP (free slot) -- no VALU divide / Newton reciprocal.
    # silu(0) == 0 exactly, preserving the zero-padding equivalence.
    return v * (0.5 * jnp.tanh(0.5 * v) + 0.5)


def glumbconv_kernel(x_ref, halo_ref, w1_ref, wdw_ref, w2_ref, o_ref):
    tl = x_ref.shape[1]
    hp2 = w1_ref.shape[1]          # 2 * Hp (Hp is a multiple of 128)
    hp = hp2 // 2

    x = x_ref[0]                   # (tl, Cp)   matmul dtype (bf16 by default)
    halo = halo_ref[0, 0]          # (2, Cp)    row 0 = row before tile, row 1 = row after

    row = lax.broadcasted_iota(jnp.int32, (tl, 1), 0)   # cheap (tl, 1) boundary masks
    is_first = row == 0
    is_last = row == tl - 1

    # inverted_conv (1x1 pointwise, fused GLU halves) + SiLU; f32 MXU accumulation.
    h = _silu(jnp.dot(x, w1_ref[...], preferred_element_type=jnp.float32))       # (tl, 2Hp)
    # Same for the two halo rows (zero halo rows stay exactly zero -> conv padding).
    # NOTE: this tiny (2, Cp) dot wastes 6/8 sublanes of its MXU passes (~a few % at
    # tl>=256); folding it into the main dot would need a VMEM copy of the tile, which
    # costs more than it saves.
    hh = _silu(jnp.dot(halo, w1_ref[...], preferred_element_type=jnp.float32))   # (2, 2Hp)

    # depthwise conv1d: kernel=3, stride=1, dilation=1, zero padding=1.
    # Non-negative rolls (XLU slot) + single-row boundary fixups from the halo.
    h_prev = jnp.where(is_first, hh[0:1, :], pltpu.roll(h, shift=1, axis=0))
    h_next = jnp.where(is_last, hh[1:2, :], pltpu.roll(h, shift=tl - 1, axis=0))
    d = (h_prev * wdw_ref[0:1, :]
         + h * wdw_ref[1:2, :]
         + h_next * wdw_ref[2:3, :])                                              # (tl, 2Hp)

    # GLU: halves live at lane-aligned columns [0:Hp) ("x") and [Hp:2Hp) (gate).
    d_a = d[:, :hp]
    d_g = d[:, hp:]
    gated = d_a * _silu(d_g)

    # point_conv (1x1 pointwise), no activation.
    y = jnp.dot(gated.astype(w2_ref.dtype), w2_ref[...],
                preferred_element_type=jnp.float32)
    o_ref[0] = y.astype(o_ref.dtype)


@functools.partial(
    jax.jit,
    static_argnames=("tl", "compute_dtype", "out_dtype", "single_buffer_weights",
                     "vmem_limit_bytes"))
def _glumbconv_impl(x, w1, wdw, w2, *, tl, compute_dtype, out_dtype,
                    single_buffer_weights, vmem_limit_bytes):
    B, L, C_in = x.shape
    H = w1.shape[1] // 2
    C_out = w2.shape[1]

    # Lane-dense (multiple-of-128) channel dims; zero padding is an exact no-op through
    # the whole network and is sliced off at the end.
    Cp = _round_up(C_in, 128)
    Hp = _round_up(H, 128)
    Op = _round_up(C_out, 128)

    n_t = _cdiv(L, tl)
    Lp = n_t * tl

    # Pad + cast activations (bf16 halves HBM/VMEM traffic; matmuls accumulate in f32).
    xp = jnp.pad(x, ((0, 0), (0, Lp - L), (0, Cp - C_in))).astype(compute_dtype)

    # Per-tile halo rows built from strided slices (no full-sequence concat copy):
    #   [..., 0, :] = x row just before the tile, [..., 1, :] = row just after.
    # Zero rows at the sequence ends reproduce the depthwise conv's zero padding.
    zero_row = jnp.zeros((B, 1, Cp), xp.dtype)
    last_rows = xp[:, tl - 1::tl, :]                       # (B, n_t, Cp)   last row of each tile
    first_rows = xp[:, tl::tl, :]                          # (B, n_t-1, Cp) first row of tiles 1..
    prev_rows = jnp.concatenate([zero_row, last_rows[:, :n_t - 1]], axis=1)
    next_rows = jnp.concatenate([first_rows, zero_row], axis=1)
    halo = jnp.stack([prev_rows, next_rows], axis=2)       # (B, n_t, 2, Cp)

    # Fused 1x1 weight: GLU halves at lane-aligned columns [0:Hp) / [Hp:2Hp) so the
    # kernel never lane-slices at the unpadded H.
    w1p = jnp.concatenate([
        jnp.pad(w1[:, :H], ((0, Cp - C_in), (0, Hp - H))),
        jnp.pad(w1[:, H:], ((0, Cp - C_in), (0, Hp - H))),
    ], axis=1).astype(compute_dtype)                       # (Cp, 2Hp)
    wdwp = jnp.concatenate([
        jnp.pad(wdw[:, :H], ((0, 0), (0, Hp - H))),
        jnp.pad(wdw[:, H:], ((0, 0), (0, Hp - H))),
    ], axis=1).astype(jnp.float32)                         # (3, 2Hp)
    w2p = jnp.pad(w2, ((0, Hp - H), (0, Op - C_out))).astype(compute_dtype)   # (Hp, Op)

    # Constant index_maps -> the weights are only DMA'd once; single-buffering them
    # additionally halves their VMEM footprint (critical on v7x's 64 MiB).
    wkw = dict(pipeline_mode=pl.Buffered(1)) if single_buffer_weights else {}

    out = pl.pallas_call(
        glumbconv_kernel,
        out_shape=jax.ShapeDtypeStruct((B, Lp, Op), out_dtype),
        grid_spec=pltpu.PrefetchScalarGridSpec(
            num_scalar_prefetch=0,
            grid=(B, n_t),
            in_specs=[
                pl.BlockSpec((1, tl, Cp), lambda b, t: (b, t, 0)),
                pl.BlockSpec((1, 1, 2, Cp), lambda b, t: (b, t, 0, 0)),
                pl.BlockSpec((Cp, 2 * Hp), lambda b, t: (0, 0), **wkw),
                pl.BlockSpec((3, 2 * Hp), lambda b, t: (0, 0), **wkw),
                pl.BlockSpec((Hp, Op), lambda b, t: (0, 0), **wkw),
            ],
            out_specs=pl.BlockSpec((1, tl, Op), lambda b, t: (b, t, 0)),
        ),
        compiler_params=pltpu.CompilerParams(
            dimension_semantics=("parallel", "parallel"),
            vmem_limit_bytes=vmem_limit_bytes,
        ),
    )(xp, halo, w1p, wdwp, w2p)

    return out[:, :L, :C_out]


def _tpu_defaults():
    """(default sequence tile, vmem_limit_bytes) per TPU generation."""
    kind = ""
    try:
        kind = jax.devices()[0].device_kind.lower()
    except Exception:
        pass
    if "v7" in kind or "tpu7" in kind:
        # v7x: 64 MiB physical VMEM per TensorCore -> smaller tile, tighter cap.
        return 256, 48 * 1024 * 1024
    if "tpu" in kind or kind.startswith("v"):
        # v5e / v6e (128 MiB physical VMEM): bigger tile amortizes ~0.35us/step overhead.
        return 512, 96 * 1024 * 1024
    # Unknown backend (e.g. interpret mode): conservative.
    return 256, 48 * 1024 * 1024


def _choose_tl(tl_req, B, L, Cp, Hp, Op, weight_bytes, vmem_limit, out_itemsize,
               in_itemsize):
    tl = max(8, _round_up(min(tl_req, _round_up(L, 8)), 8))

    def vmem_est(t):
        act_in = 2 * t * Cp * in_itemsize + 2 * 2 * Cp * in_itemsize   # x + halo (2 bufs)
        out = 2 * t * Op * out_itemsize                                # output (2 bufs)
        tmp = 5 * t * (2 * Hp) * 4 + t * Op * 4                        # live f32 temporaries
        return act_in + out + tmp + weight_bytes

    # Shrink until the estimate fits the generation's VMEM budget.
    while tl > 8 and vmem_est(tl) > 0.8 * vmem_limit:
        tl = max(8, _round_up(tl // 2, 8))
    # Megacore guard (v7x has 2 TensorCores): make sure there are >= 2 grid points.
    while tl > 8 and B * _cdiv(L, tl) < 2:
        tl = max(8, _round_up(tl // 2, 8))
    return tl


_SINGLE_BUFFER_WEIGHTS_OK = None   # set on first call; fallback if pl.Buffered(1) rejected


def glumbconv(x, w1, wdw, w2, *, tl=None, compute_dtype=jnp.bfloat16, out_dtype=None):
    """GLUMBConv forward.

    x:   (B, L, C_in)   channels-last
    w1:  (C_in, 2H)     inverted_conv weight, torch (2H, C_in, 1) transposed
    wdw: (3, 2H)        depth_conv (depthwise) weight, torch (2H, 1, 3) transposed
    w2:  (H, C_out)     point_conv weight, torch (C_out, H, 1) transposed
    """
    global _SINGLE_BUFFER_WEIGHTS_OK
    B, L, C_in = x.shape
    H = w1.shape[1] // 2
    C_out = w2.shape[1]
    Cp, Hp, Op = _round_up(C_in, 128), _round_up(H, 128), _round_up(C_out, 128)

    default_tl, vmem_limit = _tpu_defaults()
    tl_req = default_tl if tl is None else tl
    out_dt = jnp.dtype(x.dtype if out_dtype is None else out_dtype)
    in_itemsize = jnp.dtype(compute_dtype).itemsize

    def run(single_buffer):
        wbufs = 1 if single_buffer else 2
        wbytes = wbufs * (Cp * 2 * Hp * in_itemsize + 3 * 2 * Hp * 4 + Hp * Op * in_itemsize)
        tl_eff = _choose_tl(tl_req, B, L, Cp, Hp, Op, wbytes, vmem_limit,
                            out_dt.itemsize, in_itemsize)
        return _glumbconv_impl(x, w1, wdw, w2, tl=tl_eff, compute_dtype=compute_dtype,
                               out_dtype=out_dt, single_buffer_weights=single_buffer,
                               vmem_limit_bytes=vmem_limit)

    if _SINGLE_BUFFER_WEIGHTS_OK is not False:
        try:
            out = run(True)
            _SINGLE_BUFFER_WEIGHTS_OK = True
            return out
        except Exception:
            # This JAX build rejects single-buffered BlockSpecs; fall back to defaults.
            _SINGLE_BUFFER_WEIGHTS_OK = False
    return run(False)


def glumbconv_ref(x, w1, wdw, w2, compute_dtype=None):
    """Pure-JAX reference matching the PyTorch forward.  If compute_dtype is given, the
    matmul operands use the same low-precision casts as the kernel (f32 accumulation)."""
    cd = compute_dtype
    xd = x if cd is None else x.astype(cd)
    w1d = w1 if cd is None else w1.astype(cd)
    w2d = w2 if cd is None else w2.astype(cd)
    h = jnp.dot(xd, w1d, preferred_element_type=jnp.float32)
    h = h * _sigmoid(h)
    hp = jnp.pad(h, ((0, 0), (1, 1), (0, 0)))
    d = hp[:, :-2] * wdw[0] + hp[:, 1:-1] * wdw[1] + hp[:, 2:] * wdw[2]
    Hh = d.shape[-1] // 2
    a, g = d[..., :Hh], d[..., Hh:]
    gated = a * (g * _sigmoid(g))
    gated = gated if cd is None else gated.astype(cd)
    return jnp.dot(gated, w2d, preferred_element_type=jnp.float32)


if __name__ == "__main__":
    # GLUMBConv(in_features=16, hidden_features=32) -> out_feature defaults to in_features
    B, L, C_in, H = 2, 16, 16, 32
    C_out = C_in

    key = jax.random.PRNGKey(0)
    k1, k2, k3, k4 = jax.random.split(key, 4)
    x = jax.random.normal(k1, (B, L, C_in), dtype=jnp.float32)
    # inverted_conv weight: torch (2H, C_in, 1) stored transposed as (C_in, 2H)
    w1 = jax.random.normal(k2, (C_in, 2 * H), dtype=jnp.float32) / np.sqrt(C_in)
    # depth_conv (depthwise, groups=2H) weight: torch (2H, 1, 3) stored as (3, 2H)
    wdw = jax.random.normal(k3, (3, 2 * H), dtype=jnp.float32) / np.sqrt(3.0)
    # point_conv weight: torch (C_out, H, 1) stored transposed as (H, C_out)
    w2 = jax.random.normal(k4, (H, C_out), dtype=jnp.float32) / np.sqrt(H)

    # Reference using the same bf16 matmul operands as the kernel.
    ref_bf16 = glumbconv_ref(x, w1, wdw, w2, compute_dtype=jnp.bfloat16)
    ref_f32 = glumbconv_ref(x, w1, wdw, w2)

    # tl=8 -> two sequence tiles per batch element: exercises the cross-tile halo path.
    out = glumbconv(x, w1, wdw, w2, tl=8, compute_dtype=jnp.bfloat16)
    out = jax.block_until_ready(out)
    assert out.shape == (B, L, C_out) and out.dtype == x.dtype
    np.testing.assert_allclose(np.asarray(out), np.asarray(ref_bf16),
                               rtol=1e-2, atol=2e-3)

    # Default (per-generation) tile path: single tile covering the whole sequence.
    out2 = glumbconv(x, w1, wdw, w2, compute_dtype=jnp.bfloat16)
    out2 = jax.block_until_ready(out2)
    np.testing.assert_allclose(np.asarray(out2), np.asarray(ref_bf16),
                               rtol=1e-2, atol=2e-3)

    # Normwise sanity check vs the full-f32 PyTorch-equivalent forward.
    rel = (np.linalg.norm(np.asarray(out) - np.asarray(ref_f32))
           / np.linalg.norm(np.asarray(ref_f32)))
    assert rel < 3e-2, f"bf16 kernel deviates from f32 reference: rel={rel}"

    print("KERNEL_OK")
</pallas_src>

<mosaic_0001>
module attributes {stable_mosaic.version = 11 : i64} {
  func.func @glumbconv_kernel(%arg0: i32, %arg1: i32, %arg2: memref<1x8x128xbf16, #tpu.memory_space<vmem>>, %arg3: memref<1x1x2x128xbf16, #tpu.memory_space<vmem>>, %arg4: memref<128x256xbf16, #tpu.memory_space<vmem>>, %arg5: memref<3x256xf32, #tpu.memory_space<vmem>>, %arg6: memref<128x128xbf16, #tpu.memory_space<vmem>>, %arg7: memref<1x8x128xf32, #tpu.memory_space<vmem>>) attributes {dimension_semantics = [#tpu.dimension_semantics<parallel>, #tpu.dimension_semantics<parallel>], iteration_bounds = array<i64: 2, 2>, scalar_prefetch = 0 : i64, scratch_operands = 0 : i64, tpu.core_type = #tpu.core_type<tc>, window_params = [{transform_indices = @transform_0, window_bounds = array<i64: 1, 8, 128>}, {transform_indices = @transform_1, window_bounds = array<i64: 1, 1, 2, 128>}, {pipeline_mode = #tpu.pipeline_mode<synchronous>, transform_indices = @transform_2, window_bounds = array<i64: 128, 256>}, {pipeline_mode = #tpu.pipeline_mode<synchronous>, transform_indices = @transform_3, window_bounds = array<i64: 3, 256>}, {pipeline_mode = #tpu.pipeline_mode<synchronous>, transform_indices = @transform_4, window_bounds = array<i64: 128, 128>}, {transform_indices = @transform_5, window_bounds = array<i64: 1, 8, 128>}]} {
    %c0 = arith.constant 0 : index
    %c0_0 = arith.constant 0 : index
    %c0_1 = arith.constant 0 : index
    %0 = vector.load %arg2[%c0, %c0_0, %c0_1] : memref<1x8x128xbf16, #tpu.memory_space<vmem>>, vector<1x8x128xbf16>
    %1 = vector.shape_cast %0 : vector<1x8x128xbf16> to vector<8x128xbf16>
    %c0_2 = arith.constant 0 : index
    %c0_3 = arith.constant 0 : index
    %c0_4 = arith.constant 0 : index
    %c0_5 = arith.constant 0 : index
    %2 = vector.load %arg3[%c0_2, %c0_3, %c0_4, %c0_5] : memref<1x1x2x128xbf16, #tpu.memory_space<vmem>>, vector<1x1x2x128xbf16>
    %3 = vector.shape_cast %2 : vector<1x1x2x128xbf16> to vector<2x128xbf16>
    %4 = tpu.iota {dimensions = array<i32: 0>} : vector<8x1xi32>
    %c0_i32 = arith.constant 0 : i32
    %5 = vector.broadcast %c0_i32 : i32 to vector<8x1xi32>
    %6 = arith.cmpi eq, %4, %5 : vector<8x1xi32>
    %c7_i32 = arith.constant 7 : i32
    %7 = vector.broadcast %c7_i32 : i32 to vector<8x1xi32>
    %8 = arith.cmpi eq, %4, %7 : vector<8x1xi32>
    %c0_6 = arith.constant 0 : index
    %c0_7 = arith.constant 0 : index
    %9 = vector.load %arg4[%c0_6, %c0_7] : memref<128x256xbf16, #tpu.memory_space<vmem>>, vector<128x256xbf16>
    %cst = arith.constant dense<0.000000e+00> : vector<8x256xf32>
    %10 = tpu.matmul %1, %9, %cst {dimension_numbers = #tpu.dot_dimension_numbers<[1], [0], [0], [1], [0, 0, 1, 1], [], []>} : vector<8x128xbf16>, vector<128x256xbf16>, vector<8x256xf32> -> vector<8x256xf32>
    %cst_8 = arith.constant 5.000000e-01 : f32
    %11 = vector.broadcast %cst_8 : f32 to vector<8x256xf32>
    %12 = arith.mulf %11, %10 : vector<8x256xf32>
    %13 = math.tanh %12 : vector<8x256xf32>
    %cst_9 = arith.constant 5.000000e-01 : f32
    %14 = vector.broadcast %cst_9 : f32 to vector<8x256xf32>
    %15 = arith.mulf %14, %13 : vector<8x256xf32>
    %cst_10 = arith.constant 5.000000e-01 : f32
    %16 = vector.broadcast %cst_10 : f32 to vector<8x256xf32>
    %17 = arith.addf %15, %16 : vector<8x256xf32>
    %18 = arith.mulf %10, %17 : vector<8x256xf32>
    %c0_11 = arith.constant 0 : index
    %c0_12 = arith.constant 0 : index
    %19 = vector.load %arg4[%c0_11, %c0_12] : memref<128x256xbf16, #tpu.memory_space<vmem>>, vector<128x256xbf16>
    %cst_13 = arith.constant dense<0.000000e+00> : vector<2x256xf32>
    %20 = tpu.matmul %3, %19, %cst_13 {dimension_numbers = #tpu.dot_dimension_numbers<[1], [0], [0], [1], [0, 0, 1, 1], [], []>} : vector<2x128xbf16>, vector<128x256xbf16>, vector<2x256xf32> -> vector<2x256xf32>
    %cst_14 = arith.constant 5.000000e-01 : f32
    %21 = vector.broadcast %cst_14 : f32 to vector<2x256xf32>
    %22 = arith.mulf %21, %20 : vector<2x256xf32>
    %23 = math.tanh %22 : vector<2x256xf32>
    %cst_15 = arith.constant 5.000000e-01 : f32
    %24 = vector.broadcast %cst_15 : f32 to vector<2x256xf32>
    %25 = arith.mulf %24, %23 : vector<2x256xf32>
    %cst_16 = arith.constant 5.000000e-01 : f32
    %26 = vector.broadcast %cst_16 : f32 to vector<2x256xf32>
    %27 = arith.addf %25, %26 : vector<2x256xf32>
    %28 = arith.mulf %20, %27 : vector<2x256xf32>
    %29 = vector.extract_strided_slice %28 {offsets = [0, 0], sizes = [1, 256], strides = [1, 1]} : vector<2x256xf32> to vector<1x256xf32>
    %c1_i32 = arith.constant 1 : i32
    %30 = tpu.dynamic_rotate %18 by %c1_i32 dim 0 : vector<8x256xf32>, i32 -> vector<8x256xf32>
    %31 = vector.shape_cast %6 : vector<8x1xi1> to vector<8x1xi1>
    %32 = vector.broadcast %31 : vector<8x1xi1> to vector<8x256xi1>
    %33 = vector.shape_cast %29 : vector<1x256xf32> to vector<1x256xf32>
    %34 = vector.broadcast %33 : vector<1x256xf32> to vector<8x256xf32>
    %35 = arith.select %32, %34, %30 : vector<8x256xi1>, vector<8x256xf32>
    %36 = vector.extract_strided_slice %28 {offsets = [1, 0], sizes = [1, 256], strides = [1, 1]} : vector<2x256xf32> to vector<1x256xf32>
    %c7_i32_17 = arith.constant 7 : i32
    %37 = tpu.dynamic_rotate %18 by %c7_i32_17 dim 0 : vector<8x256xf32>, i32 -> vector<8x256xf32>
    %38 = vector.shape_cast %8 : vector<8x1xi1> to vector<8x1xi1>
    %39 = vector.broadcast %38 : vector<8x1xi1> to vector<8x256xi1>
    %40 = vector.shape_cast %36 : vector<1x256xf32> to vector<1x256xf32>
    %41 = vector.broadcast %40 : vector<1x256xf32> to vector<8x256xf32>
    %42 = arith.select %39, %41, %37 : vector<8x256xi1>, vector<8x256xf32>
    %c0_18 = arith.constant 0 : index
    %c0_19 = arith.constant 0 : index
    %43 = vector.load %arg5[%c0_18, %c0_19] : memref<3x256xf32, #tpu.memory_space<vmem>>, vector<1x256xf32>
    %44 = vector.broadcast %43 : vector<1x256xf32> to vector<8x256xf32>
    %45 = arith.mulf %35, %44 : vector<8x256xf32>
    %c1 = arith.constant 1 : index
    %c0_20 = arith.constant 0 : index
    %46 = vector.load %arg5[%c1, %c0_20] : memref<3x256xf32, #tpu.memory_space<vmem>>, vector<1x256xf32>
    %47 = vector.broadcast %46 : vector<1x256xf32> to vector<8x256xf32>
    %48 = arith.mulf %18, %47 : vector<8x256xf32>
    %49 = arith.addf %45, %48 : vector<8x256xf32>
    %c2 = arith.constant 2 : index
    %c0_21 = arith.constant 0 : index
    %50 = vector.load %arg5[%c2, %c0_21] : memref<3x256xf32, #tpu.memory_space<vmem>>, vector<1x256xf32>
    %51 = vector.broadcast %50 : vector<1x256xf32> to vector<8x256xf32>
    %52 = arith.mulf %42, %51 : vector<8x256xf32>
    %53 = arith.addf %49, %52 : vector<8x256xf32>
    %54 = vector.extract_strided_slice %53 {offsets = [0, 0], sizes = [8, 128], strides = [1, 1]} : vector<8x256xf32> to vector<8x128xf32>
    %55 = vector.extract_strided_slice %53 {offsets = [0, 128], sizes = [8, 128], strides = [1, 1]} : vector<8x256xf32> to vector<8x128xf32>
    %cst_22 = arith.constant 5.000000e-01 : f32
    %56 = vector.broadcast %cst_22 : f32 to vector<8x128xf32>
    %57 = arith.mulf %56, %55 : vector<8x128xf32>
    %58 = math.tanh %57 : vector<8x128xf32>
    %cst_23 = arith.constant 5.000000e-01 : f32
    %59 = vector.broadcast %cst_23 : f32 to vector<8x128xf32>
    %60 = arith.mulf %59, %58 : vector<8x128xf32>
    %cst_24 = arith.constant 5.000000e-01 : f32
    %61 = vector.broadcast %cst_24 : f32 to vector<8x128xf32>
    %62 = arith.addf %60, %61 : vector<8x128xf32>
    %63 = arith.mulf %55, %62 : vector<8x128xf32>
    %64 = arith.mulf %54, %63 : vector<8x128xf32>
    %65 = arith.truncf %64 : vector<8x128xf32> to vector<8x128xbf16>
    %c0_25 = arith.constant 0 : index
    %c0_26 = arith.constant 0 : index
    %66 = vector.load %arg6[%c0_25, %c0_26] : memref<128x128xbf16, #tpu.memory_space<vmem>>, vector<128x128xbf16>
    %cst_27 = arith.constant dense<0.000000e+00> : vector<8x128xf32>
    %67 = tpu.matmul %65, %66, %cst_27 {dimension_numbers = #tpu.dot_dimension_numbers<[1], [0], [0], [1], [0, 0, 1, 1], [], []>} : vector<8x128xbf16>, vector<128x128xbf16>, vector<8x128xf32> -> vector<8x128xf32>
    %c0_28 = arith.constant 0 : index
    %c0_29 = arith.constant 0 : index
    %c0_30 = arith.constant 0 : index
    %68 = vector.load %arg7[%c0_28, %c0_29, %c0_30] : memref<1x8x128xf32, #tpu.memory_space<vmem>>, vector<1x8x128xf32>
    %69 = vector.shape_cast %68 : vector<1x8x128xf32> to vector<8x128xf32>
    %70 = vector.shape_cast %67 : vector<8x128xf32> to vector<1x8x128xf32>
    tpu.vector_store %arg7[%c0_28, %c0_29, %c0_30], %70 {strides = array<i32>} : memref<1x8x128xf32, #tpu.memory_space<vmem>>, vector<1x8x128xf32>,
    return
  }
  func.func @transform_0(%arg0: i32, %arg1: i32) -> (i32, i32, i32) {
    %c0_i32 = arith.constant 0 : i32
    %c0_i32_0 = arith.constant 0 : i32
    return %arg0, %arg1, %c0_i32 : i32, i32, i32
  }
  func.func @transform_1(%arg0: i32, %arg1: i32) -> (i32, i32, i32, i32) {
    %c0_i32 = arith.constant 0 : i32
    %c0_i32_0 = arith.constant 0 : i32
    %c0_i32_1 = arith.constant 0 : i32
    return %arg0, %arg1, %c0_i32, %c0_i32_0 : i32, i32, i32, i32
  }
  func.func @transform_2(%arg0: i32, %arg1: i32) -> (i32, i32) {
    %c0_i32 = arith.constant 0 : i32
    %c0_i32_0 = arith.constant 0 : i32
    %c0_i32_1 = arith.constant 0 : i32
    return %c0_i32, %c0_i32_0 : i32, i32
  }
  func.func @transform_3(%arg0: i32, %arg1: i32) -> (i32, i32) {
    %c0_i32 = arith.constant 0 : i32
    %c0_i32_0 = arith.constant 0 : i32
    %c0_i32_1 = arith.constant 0 : i32
    return %c0_i32, %c0_i32_0 : i32, i32
  }
  func.func @transform_4(%arg0: i32, %arg1: i32) -> (i32, i32) {
    %c0_i32 = arith.constant 0 : i32
    %c0_i32_0 = arith.constant 0 : i32
    %c0_i32_1 = arith.constant 0 : i32
    return %c0_i32, %c0_i32_0 : i32, i32
  }
  func.func @transform_5(%arg0: i32, %arg1: i32) -> (i32, i32, i32) {
    %c0_i32 = arith.constant 0 : i32
    %c0_i32_0 = arith.constant 0 : i32
    return %arg0, %arg1, %c0_i32 : i32, i32, i32
  }
}

module attributes {stable_mosaic.version = 11 : i64} {
  func.func @glumbconv_kernel(%arg0: i32, %arg1: i32, %arg2: memref<1x8x128xbf16, #tpu.memory_space<vmem>>, %arg3: memref<1x1x2x128xbf16, #tpu.memory_space<vmem>>, %arg4: memref<128x256xbf16, #tpu.memory_space<vmem>>, %arg5: memref<3x256xf32, #tpu.memory_space<vmem>>, %arg6: memref<128x128xbf16, #tpu.memory_space<vmem>>, %arg7: memref<1x8x128xf32, #tpu.memory_space<vmem>>) attributes {dimension_semantics = [#tpu.dimension_semantics<parallel>, #tpu.dimension_semantics<parallel>], iteration_bounds = array<i64: 2, 2>, scalar_prefetch = 0 : i64, scratch_operands = 0 : i64, tpu.core_type = #tpu.core_type<tc>, window_params = [{transform_indices = @transform_0, window_bounds = array<i64: 1, 8, 128>}, {transform_indices = @transform_1, window_bounds = array<i64: 1, 1, 2, 128>}, {pipeline_mode = #tpu.pipeline_mode<synchronous>, transform_indices = @transform_2, window_bounds = array<i64: 128, 256>}, {pipeline_mode = #tpu.pipeline_mode<synchronous>, transform_indices = @transform_3, window_bounds = array<i64: 3, 256>}, {pipeline_mode = #tpu.pipeline_mode<synchronous>, transform_indices = @transform_4, window_bounds = array<i64: 128, 128>}, {transform_indices = @transform_5, window_bounds = array<i64: 1, 8, 128>}]} {
    %c0 = arith.constant 0 : index
    %c0_0 = arith.constant 0 : index
    %c0_1 = arith.constant 0 : index
    %0 = vector.load %arg2[%c0, %c0_0, %c0_1] : memref<1x8x128xbf16, #tpu.memory_space<vmem>>, vector<1x8x128xbf16>
    %1 = vector.shape_cast %0 : vector<1x8x128xbf16> to vector<8x128xbf16>
    %c0_2 = arith.constant 0 : index
    %c0_3 = arith.constant 0 : index
    %c0_4 = arith.constant 0 : index
    %c0_5 = arith.constant 0 : index
    %2 = vector.load %arg3[%c0_2, %c0_3, %c0_4, %c0_5] : memref<1x1x2x128xbf16, #tpu.memory_space<vmem>>, vector<1x1x2x128xbf16>
    %3 = vector.shape_cast %2 : vector<1x1x2x128xbf16> to vector<2x128xbf16>
    %4 = tpu.iota {dimensions = array<i32: 0>} : vector<8x1xi32>
    %c0_i32 = arith.constant 0 : i32
    %5 = vector.broadcast %c0_i32 : i32 to vector<8x1xi32>
    %6 = arith.cmpi eq, %4, %5 : vector<8x1xi32>
    %c7_i32 = arith.constant 7 : i32
    %7 = vector.broadcast %c7_i32 : i32 to vector<8x1xi32>
    %8 = arith.cmpi eq, %4, %7 : vector<8x1xi32>
    %c0_6 = arith.constant 0 : index
    %c0_7 = arith.constant 0 : index
    %9 = vector.load %arg4[%c0_6, %c0_7] : memref<128x256xbf16, #tpu.memory_space<vmem>>, vector<128x256xbf16>
    %cst = arith.constant dense<0.000000e+00> : vector<8x256xf32>
    %10 = tpu.matmul %1, %9, %cst {dimension_numbers = #tpu.dot_dimension_numbers<[1], [0], [0], [1], [0, 0, 1, 1], [], []>} : vector<8x128xbf16>, vector<128x256xbf16>, vector<8x256xf32> -> vector<8x256xf32>
    %cst_8 = arith.constant 5.000000e-01 : f32
    %11 = vector.broadcast %cst_8 : f32 to vector<8x256xf32>
    %12 = arith.mulf %11, %10 : vector<8x256xf32>
    %13 = math.tanh %12 : vector<8x256xf32>
    %cst_9 = arith.constant 5.000000e-01 : f32
    %14 = vector.broadcast %cst_9 : f32 to vector<8x256xf32>
    %15 = arith.mulf %14, %13 : vector<8x256xf32>
    %cst_10 = arith.constant 5.000000e-01 : f32
    %16 = vector.broadcast %cst_10 : f32 to vector<8x256xf32>
    %17 = arith.addf %15, %16 : vector<8x256xf32>
    %18 = arith.mulf %10, %17 : vector<8x256xf32>
    %c0_11 = arith.constant 0 : index
    %c0_12 = arith.constant 0 : index
    %19 = vector.load %arg4[%c0_11, %c0_12] : memref<128x256xbf16, #tpu.memory_space<vmem>>, vector<128x256xbf16>
    %cst_13 = arith.constant dense<0.000000e+00> : vector<2x256xf32>
    %20 = tpu.matmul %3, %19, %cst_13 {dimension_numbers = #tpu.dot_dimension_numbers<[1], [0], [0], [1], [0, 0, 1, 1], [], []>} : vector<2x128xbf16>, vector<128x256xbf16>, vector<2x256xf32> -> vector<2x256xf32>
    %cst_14 = arith.constant 5.000000e-01 : f32
    %21 = vector.broadcast %cst_14 : f32 to vector<2x256xf32>
    %22 = arith.mulf %21, %20 : vector<2x256xf32>
    %23 = math.tanh %22 : vector<2x256xf32>
    %cst_15 = arith.constant 5.000000e-01 : f32
    %24 = vector.broadcast %cst_15 : f32 to vector<2x256xf32>
    %25 = arith.mulf %24, %23 : vector<2x256xf32>
    %cst_16 = arith.constant 5.000000e-01 : f32
    %26 = vector.broadcast %cst_16 : f32 to vector<2x256xf32>
    %27 = arith.addf %25, %26 : vector<2x256xf32>
    %28 = arith.mulf %20, %27 : vector<2x256xf32>
    %29 = vector.extract_strided_slice %28 {offsets = [0, 0], sizes = [1, 256], strides = [1, 1]} : vector<2x256xf32> to vector<1x256xf32>
    %c1_i32 = arith.constant 1 : i32
    %30 = tpu.dynamic_rotate %18 by %c1_i32 dim 0 : vector<8x256xf32>, i32 -> vector<8x256xf32>
    %31 = vector.shape_cast %6 : vector<8x1xi1> to vector<8x1xi1>
    %32 = vector.broadcast %31 : vector<8x1xi1> to vector<8x256xi1>
    %33 = vector.shape_cast %29 : vector<1x256xf32> to vector<1x256xf32>
    %34 = vector.broadcast %33 : vector<1x256xf32> to vector<8x256xf32>
    %35 = arith.select %32, %34, %30 : vector<8x256xi1>, vector<8x256xf32>
    %36 = vector.extract_strided_slice %28 {offsets = [1, 0], sizes = [1, 256], strides = [1, 1]} : vector<2x256xf32> to vector<1x256xf32>
    %c7_i32_17 = arith.constant 7 : i32
    %37 = tpu.dynamic_rotate %18 by %c7_i32_17 dim 0 : vector<8x256xf32>, i32 -> vector<8x256xf32>
    %38 = vector.shape_cast %8 : vector<8x1xi1> to vector<8x1xi1>
    %39 = vector.broadcast %38 : vector<8x1xi1> to vector<8x256xi1>
    %40 = vector.shape_cast %36 : vector<1x256xf32> to vector<1x256xf32>
    %41 = vector.broadcast %40 : vector<1x256xf32> to vector<8x256xf32>
    %42 = arith.select %39, %41, %37 : vector<8x256xi1>, vector<8x256xf32>
    %c0_18 = arith.constant 0 : index
    %c0_19 = arith.constant 0 : index
    %43 = vector.load %arg5[%c0_18, %c0_19] : memref<3x256xf32, #tpu.memory_space<vmem>>, vector<1x256xf32>
    %44 = vector.broadcast %43 : vector<1x256xf32> to vector<8x256xf32>
    %45 = arith.mulf %35, %44 : vector<8x256xf32>
    %c1 = arith.constant 1 : index
    %c0_20 = arith.constant 0 : index
    %46 = vector.load %arg5[%c1, %c0_20] : memref<3x256xf32, #tpu.memory_space<vmem>>, vector<1x256xf32>
    %47 = vector.broadcast %46 : vector<1x256xf32> to vector<8x256xf32>
    %48 = arith.mulf %18, %47 : vector<8x256xf32>
    %49 = arith.addf %45, %48 : vector<8x256xf32>
    %c2 = arith.constant 2 : index
    %c0_21 = arith.constant 0 : index
    %50 = vector.load %arg5[%c2, %c0_21] : memref<3x256xf32, #tpu.memory_space<vmem>>, vector<1x256xf32>
    %51 = vector.broadcast %50 : vector<1x256xf32> to vector<8x256xf32>
    %52 = arith.mulf %42, %51 : vector<8x256xf32>
    %53 = arith.addf %49, %52 : vector<8x256xf32>
    %54 = vector.extract_strided_slice %53 {offsets = [0, 0], sizes = [8, 128], strides = [1, 1]} : vector<8x256xf32> to vector<8x128xf32>
    %55 = vector.extract_strided_slice %53 {offsets = [0, 128], sizes = [8, 128], strides = [1, 1]} : vector<8x256xf32> to vector<8x128xf32>
    %cst_22 = arith.constant 5.000000e-01 : f32
    %56 = vector.broadcast %cst_22 : f32 to vector<8x128xf32>
    %57 = arith.mulf %56, %55 : vector<8x128xf32>
    %58 = math.tanh %57 : vector<8x128xf32>
    %cst_23 = arith.constant 5.000000e-01 : f32
    %59 = vector.broadcast %cst_23 : f32 to vector<8x128xf32>
    %60 = arith.mulf %59, %58 : vector<8x128xf32>
    %cst_24 = arith.constant 5.000000e-01 : f32
    %61 = vector.broadcast %cst_24 : f32 to vector<8x128xf32>
    %62 = arith.addf %60, %61 : vector<8x128xf32>
    %63 = arith.mulf %55, %62 : vector<8x128xf32>
    %64 = arith.mulf %54, %63 : vector<8x128xf32>
    %65 = arith.truncf %64 : vector<8x128xf32> to vector<8x128xbf16>
    %c0_25 = arith.constant 0 : index
    %c0_26 = arith.constant 0 : index
    %66 = vector.load %arg6[%c0_25, %c0_26] : memref<128x128xbf16, #tpu.memory_space<vmem>>, vector<128x128xbf16>
    %cst_27 = arith.constant dense<0.000000e+00> : vector<8x128xf32>
    %67 = tpu.matmul %65, %66, %cst_27 {dimension_numbers = #tpu.dot_dimension_numbers<[1], [0], [0], [1], [0, 0, 1, 1], [], []>} : vector<8x128xbf16>, vector<128x128xbf16>, vector<8x128xf32> -> vector<8x128xf32>
    %c0_28 = arith.constant 0 : index
    %c0_29 = arith.constant 0 : index
    %c0_30 = arith.constant 0 : index
    %68 = vector.load %arg7[%c0_28, %c0_29, %c0_30] : memref<1x8x128xf32, #tpu.memory_space<vmem>>, vector<1x8x128xf32>
    %69 = vector.shape_cast %68 : vector<1x8x128xf32> to vector<8x128xf32>
    %70 = vector.shape_cast %67 : vector<8x128xf32> to vector<1x8x128xf32>
    tpu.vector_store %arg7[%c0_28, %c0_29, %c0_30], %70 {strides = array<i32>} : memref<1x8x128xf32, #tpu.memory_space<vmem>>, vector<1x8x128xf32>,
    return
  }
  func.func @transform_0(%arg0: i32, %arg1: i32) -> (i32, i32, i32) {
    %c0_i32 = arith.constant 0 : i32
    %c0_i32_0 = arith.constant 0 : i32
    return %arg0, %arg1, %c0_i32 : i32, i32, i32
  }
  func.func @transform_1(%arg0: i32, %arg1: i32) -> (i32, i32, i32, i32) {
    %c0_i32 = arith.constant 0 : i32
    %c0_i32_0 = arith.constant 0 : i32
    %c0_i32_1 = arith.constant 0 : i32
    return %arg0, %arg1, %c0_i32, %c0_i32_0 : i32, i32, i32, i32
  }
  func.func @transform_2(%arg0: i32, %arg1: i32) -> (i32, i32) {
    %c0_i32 = arith.constant 0 : i32
    %c0_i32_0 = arith.constant 0 : i32
    %c0_i32_1 = arith.constant 0 : i32
    return %c0_i32, %c0_i32_0 : i32, i32
  }
  func.func @transform_3(%arg0: i32, %arg1: i32) -> (i32, i32) {
    %c0_i32 = arith.constant 0 : i32
    %c0_i32_0 = arith.constant 0 : i32
    %c0_i32_1 = arith.constant 0 : i32
    return %c0_i32, %c0_i32_0 : i32, i32
  }
  func.func @transform_4(%arg0: i32, %arg1: i32) -> (i32, i32) {
    %c0_i32 = arith.constant 0 : i32
    %c0_i32_0 = arith.constant 0 : i32
    %c0_i32_1 = arith.constant 0 : i32
    return %c0_i32, %c0_i32_0 : i32, i32
  }
  func.func @transform_5(%arg0: i32, %arg1: i32) -> (i32, i32, i32) {
    %c0_i32 = arith.constant 0 : i32
    %c0_i32_0 = arith.constant 0 : i32
    return %arg0, %arg1, %c0_i32 : i32, i32, i32
  }
}

</mosaic_0001>

<bundles_post_ra>
// kernel: _glumbconv_impl.1
= control target key start
LH: loop header
LB: loop body
LE: loop exit
PB: predicated region body
PF: predicated region fallthrough
CT: control target
= control target key end

     0   :  { %10 = vsyncpa [#allocation3], 0  ;;  %s1320_s0 = inlined_call_operand.vmem [shape: bf16[2,16,128], index: 0, kind: input, shape index: {}]   ;;  %s1321_s1 = inlined_call_operand.vmem [shape: bf16[2,2,2,128], index: 1, kind: input, shape index: {}]   ;;  %s1322_s2 = inlined_call_operand.vmem [shape: bf16[128,256], index: 2, kind: input, shape index: {}]   ;;  %s1323_s3 = inlined_call_operand.vmem [shape: f32[3,256], index: 3, kind: input, shape index: {}]   ;;  %s1324_s4 = inlined_call_operand.vmem [shape: bf16[128,128], index: 4, kind: input, shape index: {}]   ;;  %s1325_s5 = inlined_call_operand.hbm [shape: f32[2,16,128], index: 5, kind: output, shape index: {}]  }
   0x1   :  { %12 = vsyncpa [#allocation3 + $0x1], 0  ;;  %s1093_s18 = smov 0   ;;  %s1095_s19 = smov 0  }
   0x2   :  { %s1097_s20 = smov 0   ;;  %s1099_s21 = smov 0  }
   0x3   :  { %s1101_s22 = smov 0   ;;  %s1103_s23 = smov 0  }
   0x4   :  { %s1105_s24 = smov 0   ;;  %s1107_s25 = smov 0  }
   0x5 LB: > { %s778_s26 = sadd.s32 4294967295, %s1057_s25   ;;  %s779_s27 = sadd.s32 4294967294, %s1057_s25   ;;  %s1057_s25 = sphi %s1107_s25, %s18_s25   ;;  %s1053_s24 = sphi %s1105_s24, %s1334_s24   ;;  %s1049_s23 = sphi %s1103_s23, %s1333_s23   ;;  %s1045_s22 = sphi %s1101_s22, %s1332_s22   ;;  %s1041_s21 = sphi %s1099_s21, %s1331_s21   ;;  %s1037_s20 = sphi %s1097_s20, %s1330_s20   ;;  %s1033_s19 = sphi %s1095_s19, %s1329_s19   ;;  %s1029_s18 = sphi %s1093_s18, %s1328_s18  }
   0x6   : > { %s27_s28 = sadd.s32 1, %s1049_s23  ;;  %s30_s29 = sadd.s32 1, %s1053_s24 }
   0x7   : > { %p28_p0 = scmp.ge.s32.totalorder %s27_s28, 2  ;;  %p168_p1 = scmp.ne.s32.totalorder %s1037_s20, %s1033_s19 }
   0x8   : > { %p169_p2 = scmp.eq.s32.totalorder %s778_s26, 3  ;;  %p174_p5 = scmp.ne.s32.totalorder %s1033_s19, %s1029_s18 }
   0x9   : > { %s1336_s28 = smov (%p28_p0, %s27_s28), 0  ;;  %s1338_s29 = smov (!%p28_p0, %s30_s29), %s1053_s24 }
   0xa   : > { %s154_s30 = ssub.s32 %s1049_s23, %s1336_s28  ;;  %p1144_p3 = por %p169_p2, %p168_p1 }
   0xb   : > { %p32_p4 = scmp.ge.s32.totalorder %s1338_s29, 2  ;;  %p175_p6 = scmp.eq.s32.totalorder %s779_s27, 3 }
   0xc   : > { %p782_p7 = scmp.ge.s32.totalorder %s1057_s25, 1  ;;  %p223_p9 = scmp.lt.s32.totalorder %s1057_s25, 5 }
   0xd   : > { %s1340_s29 = smov (%p32_p4, %s1338_s29), 0  ;;  %p1153_p8 = por %p175_p6, %p174_p5 }
   0xe   : > { %s153_s8 = ssub.s32 %s1053_s24, %s1340_s29  ;;  %s158_s9 = sadd.s32 1, %s1037_s20 }
   0xf   : > { %s155_s10 = sor.u32 %s154_s30, %s153_s8  ;;  %p224_p10 = pnand %p782_p7, %p223_p9 }
  0x10   : > { %p156_p11 = scmp.eq.s32.totalorder %s155_s10, 0  ;;  %v921_v0 = vld [vmem:[%s1322_s2 + $0x4] ss:$8 sps:$4 sm:$0xff] (!%p224_p10)   ;;  %v923_v1 = vld [vmem:[%s1322_s2] ss:$8 sps:$4 sm:$0xff] (!%p224_p10)   ;;  %v1059_v2 = vmov (!%p224_p10), 0   ;;  %v279_v40 = vlaneseq (!%p224_p10) }
  0x11   : > { %227 = sbr.rel (%p224_p10) target bundleno = 544 (0x220), region = 40  ;;  %411 = vmatprep.mubr.bf16.mxu0 (!%p224_p10), %v1059_v2  ;;  %462 = vmatprep.mubr.bf16.mxu1 (!%p224_p10), %v1059_v2  ;;  %v924_v3 = vld [vmem:[%s1322_s2 + $0x14] ss:$8 sps:$4 sm:$0xff] (!%p224_p10)   ;;  %v926_v4 = vld [vmem:[%s1322_s2 + $0x10] ss:$8 sps:$4 sm:$0xff] (!%p224_p10)   ;;  %p261_p12 = scmp.lt.s32.totalorder (!%p224_p10), %s1045_s22, 1 }
  0x12   : > { %s1162_s11 = scalar_select %p156_p11, %s1037_s20, %s158_s9  }
  0x13   : > { %379 = vmatprep.subr.bf16.mxu0 (!%p224_p10), %v921_v0  ;;  %430 = vmatprep.subr.bf16.mxu1 (!%p224_p10), %v921_v0  ;;  %v927_v5 = vld [vmem:[%s1322_s2 + $0x24] ss:$8 sps:$4 sm:$0xff] (!%p224_p10)   ;;  %v929_v6 = vld [vmem:[%s1322_s2 + $0x20] ss:$8 sps:$4 sm:$0xff] (!%p224_p10)   ;;  %v930_v7 = vld [vmem:[%s1322_s2 + $0x34] ss:$8 sps:$4 sm:$0xff] (!%p224_p10)  }
  0x14   : > { %380 = vmatpush1.bf16.msra.mxu0 (!%p224_p10), %v923_v1  ;;  %431 = vmatpush1.bf16.msra.mxu1 (!%p224_p10), %v923_v1  ;;  %p263_p13 = scmp.lt.s32.totalorder (!%p224_p10), %s1041_s21, 1  ;;  %v932_v8 = vld [vmem:[%s1322_s2 + $0x30] ss:$8 sps:$4 sm:$0xff] (!%p224_p10)   ;;  %v933_v9 = vld [vmem:[%s1322_s2 + $0x44] ss:$8 sps:$4 sm:$0xff] (!%p224_p10)   ;;  %v1060_v20 = vmov (!%p224_p10), 0.0  }
  0x15   : > { %381 = vmatprep.subr.bf16.mxu0 (!%p224_p10), %v924_v3  ;;  %432 = vmatprep.subr.bf16.mxu1 (!%p224_p10), %v924_v3  ;;  %v935_v10 = vld [vmem:[%s1322_s2 + $0x40] ss:$8 sps:$4 sm:$0xff] (!%p224_p10)   ;;  %v936_v11 = vld [vmem:[%s1322_s2 + $0x54] ss:$8 sps:$4 sm:$0xff] (!%p224_p10)   ;;  %v938_v12 = vld [vmem:[%s1322_s2 + $0x50] ss:$8 sps:$4 sm:$0xff] (!%p224_p10)  }
  0x16   : > { %v939_v13 = vld [vmem:[%s1322_s2 + $0x64] ss:$8 sps:$4 sm:$0xff] (!%p224_p10)   ;;  %v941_v14 = vld [vmem:[%s1322_s2 + $0x60] ss:$8 sps:$4 sm:$0xff] (!%p224_p10)   ;;  %v942_v15 = vld [vmem:[%s1322_s2 + $0x74] ss:$8 sps:$4 sm:$0xff] (!%p224_p10)  }
  0x17   : > { %v944_v16 = vld [vmem:[%s1322_s2 + $0x70] ss:$8 sps:$4 sm:$0xff] (!%p224_p10)   ;;  %v945_v19 = vld [vmem:[%s1324_s4] sm:$0xff] (!%p224_p10)   ;;  %v946_v21 = vld [vmem:[%s1324_s4 + $0x8] sm:$0xff] (!%p224_p10)   ;;  %vm1061_vm0 = vmmov (!%p224_p10), 0   ;;  %v280_v41 = vshrl.u32 (!%p224_p10), %v279_v40, 7 }
  0x18   : > { %382 = vmatpush1.bf16.msra.mxu0 %v926_v4  ;;  %433 = vmatpush1.bf16.msra.mxu1 %v926_v4  ;;  %s262_s16 = scalar_select %p261_p12, %s1045_s22, 1  ;;  %v947_v22 = vld [vmem:[%s1324_s4 + $0x10] sm:$0xff]   ;;  %v948_v23 = vld [vmem:[%s1324_s4 + $0x18] sm:$0xff]   ;;  %v949_v24 = vld [vmem:[%s1324_s4 + $0x20] sm:$0xff]  }
  0x19   : > { %383 = vmatprep.subr.bf16.mxu0 %v927_v5  ;;  %434 = vmatprep.subr.bf16.mxu1 %v927_v5  ;;  %s264_s10 = scalar_select %p263_p13, %s1041_s21, 1  ;;  %v950_v25 = vld [vmem:[%s1324_s4 + $0x28] sm:$0xff]   ;;  %v951_v26 = vld [vmem:[%s1324_s4 + $0x30] sm:$0xff]   ;;  %v952_v27 = vld [vmem:[%s1324_s4 + $0x38] sm:$0xff]   ;;  %v487_v45 = vsub.s32 0, %v280_v41  ;;  %v501_v53 = vsub.s32 1, %v280_v41 }
  0x1a   : > { %s784_s14 = sshll.u32 %s262_s16, 1  ;;  %v803_v47 = vld [vmem:[%s1323_s3 + $0x1] ss:$4 sm:$0x3]  ;;  %vm281_vm1 = vcmp.eq.s32.totalorder %v280_v41, 0  ;;  %vm282_vm2 = vcmp.eq.s32.totalorder %v280_v41, 7 }
  0x1b   : > { %s266_s26 = sadd.s32 %s784_s14, %s264_s10  ;;  %v509_v54 = vld [vmem:[%s1323_s3] ss:$4 sm:$0x3]  ;;  %v529_v57 = vrot.slane %v803_v47, %v487_v45  ;;  %v804_v60 = vld [vmem:[%s1323_s3 + $0x2] ss:$4 sm:$0x3]  ;;  %v533_v4 = vrot.slane %v803_v47, %v501_v53 }
  0x1c   : > { %384 = vmatpush1.bf16.msra.mxu0 %v929_v6  ;;  %435 = vmatpush1.bf16.msra.mxu1 %v929_v6  ;;  %s785_s16 = sshll.u32 %s266_s26, 2  ;;  %s275_s30 = scalar_lea.vmem %s1321_s1, %s266_s26  ;;  %v514_v0 = vrot.slane %v509_v54, %v487_v45  ;;  %v546_v6 = vrot.slane %v804_v60, %v487_v45 }
  0x1d   : > { %385 = vmatprep.subr.bf16.mxu0 %v930_v7  ;;  %436 = vmatprep.subr.bf16.mxu1 %v930_v7  ;;  %s268_s15 = scalar_lea.vmem %s1320_s0, %s785_s16  ;;  %v278_v18 = vld [vmem:[%s275_s30] sm:$0x1]  ;;  %s258_s27 = sand.u32 1, %s1033_s19  }
  0x1e   : > { %v277_v17 = vld [vmem:[%s268_s15] sm:$0xf]  ;;  %s783_s30 = sshll.u32 %s258_s27, 3  ;;  %s814_s8 = sshll.u32 %s1045_s22, 1 }
  0x1f   : > { %s681_s9 = sadd.s32 %s1041_s21, %s814_s8  ;;  %s260_s12 = scalar_lea.vmem [#allocation2], %s783_s30 }
  0x20   : > { %386 = vmatpush1.bf16.msra.mxu0 %v932_v8  ;;  %437 = vmatpush1.bf16.msra.mxu1 %v932_v8  ;;  %s685_s16 = sshll.u32 %s260_s12, 4  ;;  %s815_s26 = sshll.u32 %s681_s9, 7  ;;  %s1264_s16 = int_to_ptr.vmem [resolvable:$true] %s685_s16 }
  0x21   : > { %387 = vmatprep.subr.bf16.mxu0 %v933_v9  ;;  %438 = vmatprep.subr.bf16.mxu1 %v933_v9  ;;  %v518_v9 = vrot.slane %v509_v54, %v501_v53  ;;  %s1269_s14 = scalar_lea.hbm %s1325_s5, %s815_s26  ;;  %s670_s15 = scalar_lea.sflag [#allocation3], %s258_s27 }
  0x22   : > { %s963_s22 = scalar_lea.vmem %s1264_s16, 128  ;;  %s1062_s21 = smov [#allocation2]  }
  0x23   : > { %p964_p0 = scmp.ne.s32.totalorder %s1264_s16, %s963_s22  ;;  %s967_s17 = sshll.u32 %s1062_s21, 4  ;;  %s968_s17 = int_to_ptr.vmem [resolvable:$false] %s967_s17 }
  0x24   : > { %388 = vmatpush1.bf16.msra.mxu0 %v935_v10  ;;  %439 = vmatpush1.bf16.msra.mxu1 %v935_v10  ;;  %s969_s30 = scalar_lea.vmem %s968_s17, 256  ;;  %p970_p4 = scmp.lt.s32.totalorder %s1264_s16, %s968_s17 }
  0x25   : > { %389 = vmatprep.subr.bf16.mxu0 %v936_v11  ;;  %440 = vmatprep.subr.bf16.mxu1 %v936_v11  ;;  %p965_p1 = pnand %p964_p0, %p1144_p3  ;;  %p971_p5 = scmp.lt.s32.totalorder %s969_s30, %s963_s22 }
  0x27   : > { %p966_p2 = pneg %p965_p1  ;;  %p972_p6 = por %p971_p5, %p970_p4 }
  0x28   : > { %390 = vmatpush1.bf16.msra.mxu0 %v938_v12  ;;  %441 = vmatpush1.bf16.msra.mxu1 %v938_v12 }
  0x29   : > { %391 = vmatprep.subr.bf16.mxu0 %v939_v13  ;;  %442 = vmatprep.subr.bf16.mxu1 %v939_v13  ;;  %p973_p7 = pnand %p972_p6, %p966_p2 }
  0x2c   : > { %392 = vmatpush1.bf16.msra.mxu0 %v941_v14  ;;  %443 = vmatpush1.bf16.msra.mxu1 %v941_v14 }
  0x2d   : > { %393 = vmatprep.subr.bf16.mxu0 %v942_v15  ;;  %444 = vmatprep.subr.bf16.mxu1 %v942_v15 }
  0x30   : > { %394 = vmatpush1.bf16.msra.mxu0 %v944_v16  ;;  %445 = vmatpush1.bf16.msra.mxu1 %v944_v16  ;;  %v550_v16 = vrot.slane %v804_v60, %v501_v53 }
  0x31   : > { %827 = vmatprep.subr.bf16.mxu0 %v1060_v20 }
  0x33   : > { %412 = vmatmul.mubr.bf16.vlgmr.msra.gmra.mrb[0].mxu0 %v277_v17  ;;  %463 = vmatmul.mubr.bf16.vlgmr.msra.gmra.mrb[0].mxu1 %v278_v18 }
  0x34   : > { %828 = vmatpush3.bf16.msra.mxu0 %v945_v19  ;;  %843 = vmatprep.mubr.msk.bf16.mxu0 %vm1061_vm0, %v1060_v20 }
  0x35   : > { %829 = vmatprep.subr.bf16.mxu0 %v1060_v20 }
  0x38   : > { %830 = vmatpush3.bf16.msra.mxu0 %v946_v21 }
  0x39   : > { %831 = vmatprep.subr.bf16.mxu0 %v1060_v20 }
  0x3c   : > { %832 = vmatpush3.bf16.msra.mxu0 %v947_v22 }
  0x3d   : > { %833 = vmatprep.subr.bf16.mxu0 %v1060_v20 }
  0x40   : > { %834 = vmatpush3.bf16.msra.mxu0 %v948_v23 }
  0x41   : > { %835 = vmatprep.subr.bf16.mxu0 %v1060_v20 }
  0x44   : > { %836 = vmatpush3.bf16.msra.mxu0 %v949_v24 }
  0x45   : > { %837 = vmatprep.subr.bf16.mxu0 %v1060_v20 }
  0x48   : > { %838 = vmatpush3.bf16.msra.mxu0 %v950_v25 }
  0x49   : > { %839 = vmatprep.subr.bf16.mxu0 %v1060_v20 }
  0x4c   : > { %840 = vmatpush3.bf16.msra.mxu0 %v951_v26 }
  0x4d   : > { %841 = vmatprep.subr.bf16.mxu0 %v1060_v20 }
  0x50   : > { %842 = vmatpush3.bf16.msra.mxu0 %v952_v27 }
 0x106   : > { %v413_v28 = vpop.f32.mrb[0].mxu0  ;;  %v464_v29 = vpop.f32.mrb[0].mxu1 }
 0x107   : > { %v420_v30 = vmul.f32 0.5, %v413_v28  ;;  %v471_v31 = vmul.f32 0.5, %v464_v29  ;;  %v415_v32 = vpop.f32.mrb[1].mxu0  ;;  %v466_v33 = vpop.f32.mrb[1].mxu1 }
 0x108   : > { %v421_v34 = vmul.f32 0.5, %v415_v32  ;;  %v472_v35 = vmul.f32 0.5, %v466_v33  ;;  %v417_v36 = vpop.f32.mrb[2].mxu0  ;;  %v468_v37 = vpop.f32.mrb[2].mxu1 }
 0x109   : > { %953 = vtanh.f32 %v420_v30  ;;  %v418_v38 = vpop.f32.mrb[3].mxu0  ;;  %v469_v39 = vpop.f32.mrb[3].mxu1 }
 0x10a   : > { %955 = vtanh.f32 %v471_v31 }
 0x10b   : > { %957 = vtanh.f32 %v421_v34 }
 0x10c   : > { %959 = vtanh.f32 %v472_v35 }
 0x113   : > { %v954_v42 = vpop.eup %953 }
 0x114   : > { %v956_v43 = vpop.eup %955  ;;  %v424_v44 = vmul.f32 0.5, %v954_v42 }
 0x115   : > { %v958_v46 = vpop.eup %957  ;;  %v475_v48 = vmul.f32 0.5, %v956_v43 }
 0x116   : > { %v960_v49 = vpop.eup %959  ;;  %v426_v50 = vadd.f32 0.5, %v424_v44  ;;  %v425_v51 = vmul.f32 0.5, %v958_v46 }
 0x117   : > { %v477_v52 = vadd.f32 0.5, %v475_v48  ;;  %v476_v55 = vmul.f32 0.5, %v960_v49 }
 0x118   : > { %v428_v56 = vmul.f32 %v426_v50, %v413_v28  ;;  %v427_v58 = vadd.f32 0.5, %v425_v51 }
 0x119   : > { %v479_v59 = vmul.f32 %v477_v52, %v464_v29  ;;  %v478_v61 = vadd.f32 0.5, %v476_v55 }
 0x11a   : > { %v481_v62 = vrot.slane %v428_v56, 7  ;;  %v495_v63 = vrot.slane %v428_v56, 1  ;;  %v429_v1 = vmul.f32 %v427_v58, %v415_v32  ;;  %v536_v14 = vmul.f32 %v529_v57, %v428_v56 }
 0x11b   : > { %v488_v2 = vrot.slane %v479_v59, %v487_v45  ;;  %v502_v3 = vrot.slane %v479_v59, %v501_v53  ;;  %v480_v5 = vmul.f32 %v478_v61, %v466_v33 }
 0x11c   : > { %v482_v7 = vrot.slane %v429_v1, 7  ;;  %v496_v8 = vrot.slane %v429_v1, 1  ;;  %v537_v21 = vmul.f32 %v533_v4, %v429_v1 }
 0x11d   : > { %v493_v10 = vsel %vm281_vm1, %v488_v2, %v481_v62  ;;  %v507_v11 = vsel %vm282_vm2, %v502_v3, %v495_v63  ;;  %v492_v12 = vrot.slane %v480_v5, %v487_v45  ;;  %v506_v13 = vrot.slane %v480_v5, %v501_v53 }
 0x11e   : > { %v521_v15 = vmul.f32 %v514_v0, %v493_v10  ;;  %v553_v20 = vmul.f32 %v546_v6, %v507_v11 }
 0x11f   : > { %v494_v17 = vsel %vm281_vm1, %v492_v12, %v482_v7  ;;  %v508_v18 = vsel %vm282_vm2, %v506_v13, %v496_v8 }
 0x120   : > { %v538_v19 = vadd.f32 %v536_v14, %v521_v15  ;;  %v522_v22 = vmul.f32 %v518_v9, %v494_v17  ;;  %v554_v24 = vmul.f32 %v550_v16, %v508_v18 }
 0x122   : > { %v539_v23 = vadd.f32 %v537_v21, %v522_v22  ;;  %v555_v25 = vadd.f32 %v553_v20, %v538_v19 }
 0x124   : > { %v556_v26 = vadd.f32 %v554_v24, %v539_v23 }
 0x126   : > { %v557_v27 = vmul.f32 0.5, %v556_v26 }
 0x128   : > { %961 = vtanh.f32 %v557_v27 }
 0x132   : > { %v962_v28 = vpop.eup %961 }
 0x133   : > { %v559_v29 = vmul.f32 0.5, %v962_v28 }
 0x135   : > { %v560_v30 = vadd.f32 0.5, %v559_v29 }
 0x137   : > { %v561_v31 = vmul.f32 %v560_v30, %v556_v26 }
 0x139   : > { %v562_v32 = vmul.f32 %v561_v31, %v555_v25 }
 0x13b   : > { %v563_v33 = vpack.c.bf16 %v562_v32, %v562_v32 }
 0x13d   : > { %844 = vmatmul.mubr.bf16.vlgmr.msra.gmra.mrb[4].mxu0 %v563_v33 }
 0x210   : > { %v662_v34 = vpop.f32.mrb[4].mxu0 }
 0x211   : > { %668 = vst [vmem:[%s260_s12] sm:$0xff] %v662_v34  ;;  %v845_v35 = vpop.f32.mrb[5].mxu0 }
 0x212   : > { %v665_v36 = vpop.f32.mrb[6].mxu0 }
 0x213   : > { %976 = shalt.err (!%p973_p7)
}
 0x214   : > { %s977_s27 = scalar_lea.hbm %s1269_s14, 128  ;;  %s981_s12 = scalar_lea.hbm %s1325_s5, 512 }
 0x215   : > { %p978_p9 = scmp.ne.s32.totalorder %s1269_s14, %s977_s27  ;;  %p982_p12 = scmp.lt.u32.totalorder %s1269_s14, %s1325_s5 }
 0x216   : > { %p983_p13 = scmp.lt.u32.totalorder %s981_s12, %s977_s27  ;;  %p985_p1 = scmp.lt.u32.totalorder %s977_s27, %s1269_s14 }
 0x217   : > { %p979_p10 = pnand %p978_p9, %p1144_p3 }
 0x218   : > { %p984_p0 = por %p983_p13, %p982_p12 }
 0x219   : > { %p980_p11 = pneg %p979_p10 }
 0x21a   : > { %p986_p2 = por %p985_p1, %p984_p0 }
 0x21c   : > { %p987_p4 = pnand %p986_p2, %p980_p11 }
 0x21e   : > { %990 = shalt.err (!%p987_p4)
}
 0x21f   : > { %847 = dma.vmem_to_hbm [thread:$0]  (%p1144_p3), %s1264_s16, 128, %s1269_s14, %s670_s15   ;;  %v846_v37 = vpop.f32.mrb[7].mxu0 }
 0x220 PF: > { %p853_p5 = scmp.ge.s32.totalorder %s1057_s25, 2  ;;  %s697_s10 = sand.u32 1, %s1029_s18  }
 0x221   : > { %s698_s22 = scalar_lea.sflag [#allocation3], %s697_s10 }
 0x222   : > { %p850_p6 = pnand %p853_p5, %p1153_p8 }
 0x224   : > { %1024 = dma.done.wait (!%p850_p6), %s698_s22, 128  }
 0x225   : > { %1026 = vsyncadd (!%p850_p6), %s698_s22, 4294967168  ;;  %s18_s25 = sadd.s32 1, %s1057_s25   ;;  %s1328_s18 = smov %s1033_s19 }
 0x226   : > { %p15_p7 = scmp.ge.s32.totalorder %s18_s25, 6   ;;  %s1329_s19 = smov %s1037_s20 }
 0x227   : > { %s1330_s20 = smov %s1162_s11  ;;  %s1331_s21 = smov %s1049_s23 }
 0x228   : > { %s1332_s22 = smov %s1053_s24  ;;  %s1333_s23 = smov %s1336_s28 }
 0x229   : > { %s1334_s24 = smov %s1340_s29  ;;  %17 = sbr.rel (!%p15_p7) target bundleno = 5 (0x5), region = 80 }
 0x230   :  { %703 = vsyncpa [#allocation3], 1 }
 0x231   :  { %705 = vsyncpa [#allocation3 + $0x1], 1 }

// kernel: _glumbconv_impl.1
= control target key start
LH: loop header
LB: loop body
LE: loop exit
PB: predicated region body
PF: predicated region fallthrough
CT: control target
= control target key end

     0   :  { %10 = vsyncpa [#allocation3], 0  ;;  %s1320_s0 = inlined_call_operand.vmem [shape: bf16[2,16,128], index: 0, kind: input, shape index: {}]   ;;  %s1321_s1 = inlined_call_operand.vmem [shape: bf16[2,2,2,128], index: 1, kind: input, shape index: {}]   ;;  %s1322_s2 = inlined_call_operand.vmem [shape: bf16[128,256], index: 2, kind: input, shape index: {}]   ;;  %s1323_s3 = inlined_call_operand.vmem [shape: f32[3,256], index: 3, kind: input, shape index: {}]   ;;  %s1324_s4 = inlined_call_operand.vmem [shape: bf16[128,128], index: 4, kind: input, shape index: {}]   ;;  %s1325_s5 = inlined_call_operand.hbm [shape: f32[2,16,128], index: 5, kind: output, shape index: {}]  }
   0x1   :  { %12 = vsyncpa [#allocation3 + $0x1], 0  ;;  %s1093_s18 = smov 0   ;;  %s1095_s19 = smov 0  }
   0x2   :  { %s1097_s20 = smov 0   ;;  %s1099_s21 = smov 0  }
   0x3   :  { %s1101_s22 = smov 0   ;;  %s1103_s23 = smov 0  }
   0x4   :  { %s1105_s24 = smov 0   ;;  %s1107_s25 = smov 0  }
   0x5 LB: > { %s778_s26 = sadd.s32 4294967295, %s1057_s25   ;;  %s779_s27 = sadd.s32 4294967294, %s1057_s25   ;;  %s1057_s25 = sphi %s1107_s25, %s18_s25   ;;  %s1053_s24 = sphi %s1105_s24, %s1334_s24   ;;  %s1049_s23 = sphi %s1103_s23, %s1333_s23   ;;  %s1045_s22 = sphi %s1101_s22, %s1332_s22   ;;  %s1041_s21 = sphi %s1099_s21, %s1331_s21   ;;  %s1037_s20 = sphi %s1097_s20, %s1330_s20   ;;  %s1033_s19 = sphi %s1095_s19, %s1329_s19   ;;  %s1029_s18 = sphi %s1093_s18, %s1328_s18  }
   0x6   : > { %s27_s28 = sadd.s32 1, %s1049_s23  ;;  %s30_s29 = sadd.s32 1, %s1053_s24 }
   0x7   : > { %p28_p0 = scmp.ge.s32.totalorder %s27_s28, 2  ;;  %p168_p1 = scmp.ne.s32.totalorder %s1037_s20, %s1033_s19 }
   0x8   : > { %p169_p2 = scmp.eq.s32.totalorder %s778_s26, 3  ;;  %p174_p5 = scmp.ne.s32.totalorder %s1033_s19, %s1029_s18 }
   0x9   : > { %s1336_s28 = smov (%p28_p0, %s27_s28), 0  ;;  %s1338_s29 = smov (!%p28_p0, %s30_s29), %s1053_s24 }
   0xa   : > { %s154_s30 = ssub.s32 %s1049_s23, %s1336_s28  ;;  %p1144_p3 = por %p169_p2, %p168_p1 }
   0xb   : > { %p32_p4 = scmp.ge.s32.totalorder %s1338_s29, 2  ;;  %p175_p6 = scmp.eq.s32.totalorder %s779_s27, 3 }
   0xc   : > { %p782_p7 = scmp.ge.s32.totalorder %s1057_s25, 1  ;;  %p223_p9 = scmp.lt.s32.totalorder %s1057_s25, 5 }
   0xd   : > { %s1340_s29 = smov (%p32_p4, %s1338_s29), 0  ;;  %p1153_p8 = por %p175_p6, %p174_p5 }
   0xe   : > { %s153_s8 = ssub.s32 %s1053_s24, %s1340_s29  ;;  %s158_s9 = sadd.s32 1, %s1037_s20 }
   0xf   : > { %s155_s10 = sor.u32 %s154_s30, %s153_s8  ;;  %p224_p10 = pnand %p782_p7, %p223_p9 }
  0x10   : > { %p156_p11 = scmp.eq.s32.totalorder %s155_s10, 0  ;;  %v921_v0 = vld [vmem:[%s1322_s2 + $0x4] ss:$8 sps:$4 sm:$0xff] (!%p224_p10)   ;;  %v923_v1 = vld [vmem:[%s1322_s2] ss:$8 sps:$4 sm:$0xff] (!%p224_p10)   ;;  %v1059_v2 = vmov (!%p224_p10), 0   ;;  %v279_v40 = vlaneseq (!%p224_p10) }
  0x11   : > { %227 = sbr.rel (%p224_p10) target bundleno = 544 (0x220), region = 40  ;;  %411 = vmatprep.mubr.bf16.mxu0 (!%p224_p10), %v1059_v2  ;;  %462 = vmatprep.mubr.bf16.mxu1 (!%p224_p10), %v1059_v2  ;;  %v924_v3 = vld [vmem:[%s1322_s2 + $0x14] ss:$8 sps:$4 sm:$0xff] (!%p224_p10)   ;;  %v926_v4 = vld [vmem:[%s1322_s2 + $0x10] ss:$8 sps:$4 sm:$0xff] (!%p224_p10)   ;;  %p261_p12 = scmp.lt.s32.totalorder (!%p224_p10), %s1045_s22, 1 }
  0x12   : > { %s1162_s11 = scalar_select %p156_p11, %s1037_s20, %s158_s9  }
  0x13   : > { %379 = vmatprep.subr.bf16.mxu0 (!%p224_p10), %v921_v0  ;;  %430 = vmatprep.subr.bf16.mxu1 (!%p224_p10), %v921_v0  ;;  %v927_v5 = vld [vmem:[%s1322_s2 + $0x24] ss:$8 sps:$4 sm:$0xff] (!%p224_p10)   ;;  %v929_v6 = vld [vmem:[%s1322_s2 + $0x20] ss:$8 sps:$4 sm:$0xff] (!%p224_p10)   ;;  %v930_v7 = vld [vmem:[%s1322_s2 + $0x34] ss:$8 sps:$4 sm:$0xff] (!%p224_p10)  }
  0x14   : > { %380 = vmatpush1.bf16.msra.mxu0 (!%p224_p10), %v923_v1  ;;  %431 = vmatpush1.bf16.msra.mxu1 (!%p224_p10), %v923_v1  ;;  %p263_p13 = scmp.lt.s32.totalorder (!%p224_p10), %s1041_s21, 1  ;;  %v932_v8 = vld [vmem:[%s1322_s2 + $0x30] ss:$8 sps:$4 sm:$0xff] (!%p224_p10)   ;;  %v933_v9 = vld [vmem:[%s1322_s2 + $0x44] ss:$8 sps:$4 sm:$0xff] (!%p224_p10)   ;;  %v1060_v20 = vmov (!%p224_p10), 0.0  }
  0x15   : > { %381 = vmatprep.subr.bf16.mxu0 (!%p224_p10), %v924_v3  ;;  %432 = vmatprep.subr.bf16.mxu1 (!%p224_p10), %v924_v3  ;;  %v935_v10 = vld [vmem:[%s1322_s2 + $0x40] ss:$8 sps:$4 sm:$0xff] (!%p224_p10)   ;;  %v936_v11 = vld [vmem:[%s1322_s2 + $0x54] ss:$8 sps:$4 sm:$0xff] (!%p224_p10)   ;;  %v938_v12 = vld [vmem:[%s1322_s2 + $0x50] ss:$8 sps:$4 sm:$0xff] (!%p224_p10)  }
  0x16   : > { %v939_v13 = vld [vmem:[%s1322_s2 + $0x64] ss:$8 sps:$4 sm:$0xff] (!%p224_p10)   ;;  %v941_v14 = vld [vmem:[%s1322_s2 + $0x60] ss:$8 sps:$4 sm:$0xff] (!%p224_p10)   ;;  %v942_v15 = vld [vmem:[%s1322_s2 + $0x74] ss:$8 sps:$4 sm:$0xff] (!%p224_p10)  }
  0x17   : > { %v944_v16 = vld [vmem:[%s1322_s2 + $0x70] ss:$8 sps:$4 sm:$0xff] (!%p224_p10)   ;;  %v945_v19 = vld [vmem:[%s1324_s4] sm:$0xff] (!%p224_p10)   ;;  %v946_v21 = vld [vmem:[%s1324_s4 + $0x8] sm:$0xff] (!%p224_p10)   ;;  %vm1061_vm0 = vmmov (!%p224_p10), 0   ;;  %v280_v41 = vshrl.u32 (!%p224_p10), %v279_v40, 7 }
  0x18   : > { %382 = vmatpush1.bf16.msra.mxu0 %v926_v4  ;;  %433 = vmatpush1.bf16.msra.mxu1 %v926_v4  ;;  %s262_s16 = scalar_select %p261_p12, %s1045_s22, 1  ;;  %v947_v22 = vld [vmem:[%s1324_s4 + $0x10] sm:$0xff]   ;;  %v948_v23 = vld [vmem:[%s1324_s4 + $0x18] sm:$0xff]   ;;  %v949_v24 = vld [vmem:[%s1324_s4 + $0x20] sm:$0xff]  }
  0x19   : > { %383 = vmatprep.subr.bf16.mxu0 %v927_v5  ;;  %434 = vmatprep.subr.bf16.mxu1 %v927_v5  ;;  %s264_s10 = scalar_select %p263_p13, %s1041_s21, 1  ;;  %v950_v25 = vld [vmem:[%s1324_s4 + $0x28] sm:$0xff]   ;;  %v951_v26 = vld [vmem:[%s1324_s4 + $0x30] sm:$0xff]   ;;  %v952_v27 = vld [vmem:[%s1324_s4 + $0x38] sm:$0xff]   ;;  %v487_v45 = vsub.s32 0, %v280_v41  ;;  %v501_v53 = vsub.s32 1, %v280_v41 }
  0x1a   : > { %s784_s14 = sshll.u32 %s262_s16, 1  ;;  %v803_v47 = vld [vmem:[%s1323_s3 + $0x1] ss:$4 sm:$0x3]  ;;  %vm281_vm1 = vcmp.eq.s32.totalorder %v280_v41, 0  ;;  %vm282_vm2 = vcmp.eq.s32.totalorder %v280_v41, 7 }
  0x1b   : > { %s266_s26 = sadd.s32 %s784_s14, %s264_s10  ;;  %v509_v54 = vld [vmem:[%s1323_s3] ss:$4 sm:$0x3]  ;;  %v529_v57 = vrot.slane %v803_v47, %v487_v45  ;;  %v804_v60 = vld [vmem:[%s1323_s3 + $0x2] ss:$4 sm:$0x3]  ;;  %v533_v4 = vrot.slane %v803_v47, %v501_v53 }
  0x1c   : > { %384 = vmatpush1.bf16.msra.mxu0 %v929_v6  ;;  %435 = vmatpush1.bf16.msra.mxu1 %v929_v6  ;;  %s785_s16 = sshll.u32 %s266_s26, 2  ;;  %s275_s30 = scalar_lea.vmem %s1321_s1, %s266_s26  ;;  %v514_v0 = vrot.slane %v509_v54, %v487_v45  ;;  %v546_v6 = vrot.slane %v804_v60, %v487_v45 }
  0x1d   : > { %385 = vmatprep.subr.bf16.mxu0 %v930_v7  ;;  %436 = vmatprep.subr.bf16.mxu1 %v930_v7  ;;  %s268_s15 = scalar_lea.vmem %s1320_s0, %s785_s16  ;;  %v278_v18 = vld [vmem:[%s275_s30] sm:$0x1]  ;;  %s258_s27 = sand.u32 1, %s1033_s19  }
  0x1e   : > { %v277_v17 = vld [vmem:[%s268_s15] sm:$0xf]  ;;  %s783_s30 = sshll.u32 %s258_s27, 3  ;;  %s814_s8 = sshll.u32 %s1045_s22, 1 }
  0x1f   : > { %s681_s9 = sadd.s32 %s1041_s21, %s814_s8  ;;  %s260_s12 = scalar_lea.vmem [#allocation2], %s783_s30 }
  0x20   : > { %386 = vmatpush1.bf16.msra.mxu0 %v932_v8  ;;  %437 = vmatpush1.bf16.msra.mxu1 %v932_v8  ;;  %s685_s16 = sshll.u32 %s260_s12, 4  ;;  %s815_s26 = sshll.u32 %s681_s9, 7  ;;  %s1264_s16 = int_to_ptr.vmem [resolvable:$true] %s685_s16 }
  0x21   : > { %387 = vmatprep.subr.bf16.mxu0 %v933_v9  ;;  %438 = vmatprep.subr.bf16.mxu1 %v933_v9  ;;  %v518_v9 = vrot.slane %v509_v54, %v501_v53  ;;  %s1269_s14 = scalar_lea.hbm %s1325_s5, %s815_s26  ;;  %s670_s15 = scalar_lea.sflag [#allocation3], %s258_s27 }
  0x22   : > { %s963_s22 = scalar_lea.vmem %s1264_s16, 128  ;;  %s1062_s21 = smov [#allocation2]  }
  0x23   : > { %p964_p0 = scmp.ne.s32.totalorder %s1264_s16, %s963_s22  ;;  %s967_s17 = sshll.u32 %s1062_s21, 4  ;;  %s968_s17 = int_to_ptr.vmem [resolvable:$false] %s967_s17 }
  0x24   : > { %388 = vmatpush1.bf16.msra.mxu0 %v935_v10  ;;  %439 = vmatpush1.bf16.msra.mxu1 %v935_v10  ;;  %s969_s30 = scalar_lea.vmem %s968_s17, 256  ;;  %p970_p4 = scmp.lt.s32.totalorder %s1264_s16, %s968_s17 }
  0x25   : > { %389 = vmatprep.subr.bf16.mxu0 %v936_v11  ;;  %440 = vmatprep.subr.bf16.mxu1 %v936_v11  ;;  %p965_p1 = pnand %p964_p0, %p1144_p3  ;;  %p971_p5 = scmp.lt.s32.totalorder %s969_s30, %s963_s22 }
  0x27   : > { %p966_p2 = pneg %p965_p1  ;;  %p972_p6 = por %p971_p5, %p970_p4 }
  0x28   : > { %390 = vmatpush1.bf16.msra.mxu0 %v938_v12  ;;  %441 = vmatpush1.bf16.msra.mxu1 %v938_v12 }
  0x29   : > { %391 = vmatprep.subr.bf16.mxu0 %v939_v13  ;;  %442 = vmatprep.subr.bf16.mxu1 %v939_v13  ;;  %p973_p7 = pnand %p972_p6, %p966_p2 }
  0x2c   : > { %392 = vmatpush1.bf16.msra.mxu0 %v941_v14  ;;  %443 = vmatpush1.bf16.msra.mxu1 %v941_v14 }
  0x2d   : > { %393 = vmatprep.subr.bf16.mxu0 %v942_v15  ;;  %444 = vmatprep.subr.bf16.mxu1 %v942_v15 }
  0x30   : > { %394 = vmatpush1.bf16.msra.mxu0 %v944_v16  ;;  %445 = vmatpush1.bf16.msra.mxu1 %v944_v16  ;;  %v550_v16 = vrot.slane %v804_v60, %v501_v53 }
  0x31   : > { %827 = vmatprep.subr.bf16.mxu0 %v1060_v20 }
  0x33   : > { %412 = vmatmul.mubr.bf16.vlgmr.msra.gmra.mrb[0].mxu0 %v277_v17  ;;  %463 = vmatmul.mubr.bf16.vlgmr.msra.gmra.mrb[0].mxu1 %v278_v18 }
  0x34   : > { %828 = vmatpush3.bf16.msra.mxu0 %v945_v19  ;;  %843 = vmatprep.mubr.msk.bf16.mxu0 %vm1061_vm0, %v1060_v20 }
  0x35   : > { %829 = vmatprep.subr.bf16.mxu0 %v1060_v20 }
  0x38   : > { %830 = vmatpush3.bf16.msra.mxu0 %v946_v21 }
  0x39   : > { %831 = vmatprep.subr.bf16.mxu0 %v1060_v20 }
  0x3c   : > { %832 = vmatpush3.bf16.msra.mxu0 %v947_v22 }
  0x3d   : > { %833 = vmatprep.subr.bf16.mxu0 %v1060_v20 }
  0x40   : > { %834 = vmatpush3.bf16.msra.mxu0 %v948_v23 }
  0x41   : > { %835 = vmatprep.subr.bf16.mxu0 %v1060_v20 }
  0x44   : > { %836 = vmatpush3.bf16.msra.mxu0 %v949_v24 }
  0x45   : > { %837 = vmatprep.subr.bf16.mxu0 %v1060_v20 }
  0x48   : > { %838 = vmatpush3.bf16.msra.mxu0 %v950_v25 }
  0x49   : > { %839 = vmatprep.subr.bf16.mxu0 %v1060_v20 }
  0x4c   : > { %840 = vmatpush3.bf16.msra.mxu0 %v951_v26 }
  0x4d   : > { %841 = vmatprep.subr.bf16.mxu0 %v1060_v20 }
  0x50   : > { %842 = vmatpush3.bf16.msra.mxu0 %v952_v27 }
 0x106   : > { %v413_v28 = vpop.f32.mrb[0].mxu0  ;;  %v464_v29 = vpop.f32.mrb[0].mxu1 }
 0x107   : > { %v420_v30 = vmul.f32 0.5, %v413_v28  ;;  %v471_v31 = vmul.f32 0.5, %v464_v29  ;;  %v415_v32 = vpop.f32.mrb[1].mxu0  ;;  %v466_v33 = vpop.f32.mrb[1].mxu1 }
 0x108   : > { %v421_v34 = vmul.f32 0.5, %v415_v32  ;;  %v472_v35 = vmul.f32 0.5, %v466_v33  ;;  %v417_v36 = vpop.f32.mrb[2].mxu0  ;;  %v468_v37 = vpop.f32.mrb[2].mxu1 }
 0x109   : > { %953 = vtanh.f32 %v420_v30  ;;  %v418_v38 = vpop.f32.mrb[3].mxu0  ;;  %v469_v39 = vpop.f32.mrb[3].mxu1 }
 0x10a   : > { %955 = vtanh.f32 %v471_v31 }
 0x10b   : > { %957 = vtanh.f32 %v421_v34 }
 0x10c   : > { %959 = vtanh.f32 %v472_v35 }
 0x113   : > { %v954_v42 = vpop.eup %953 }
 0x114   : > { %v956_v43 = vpop.eup %955  ;;  %v424_v44 = vmul.f32 0.5, %v954_v42 }
 0x115   : > { %v958_v46 = vpop.eup %957  ;;  %v475_v48 = vmul.f32 0.5, %v956_v43 }
 0x116   : > { %v960_v49 = vpop.eup %959  ;;  %v426_v50 = vadd.f32 0.5, %v424_v44  ;;  %v425_v51 = vmul.f32 0.5, %v958_v46 }
 0x117   : > { %v477_v52 = vadd.f32 0.5, %v475_v48  ;;  %v476_v55 = vmul.f32 0.5, %v960_v49 }
 0x118   : > { %v428_v56 = vmul.f32 %v426_v50, %v413_v28  ;;  %v427_v58 = vadd.f32 0.5, %v425_v51 }
 0x119   : > { %v479_v59 = vmul.f32 %v477_v52, %v464_v29  ;;  %v478_v61 = vadd.f32 0.5, %v476_v55 }
 0x11a   : > { %v481_v62 = vrot.slane %v428_v56, 7  ;;  %v495_v63 = vrot.slane %v428_v56, 1  ;;  %v429_v1 = vmul.f32 %v427_v58, %v415_v32  ;;  %v536_v14 = vmul.f32 %v529_v57, %v428_v56 }
 0x11b   : > { %v488_v2 = vrot.slane %v479_v59, %v487_v45  ;;  %v502_v3 = vrot.slane %v479_v59, %v501_v53  ;;  %v480_v5 = vmul.f32 %v478_v61, %v466_v33 }
 0x11c   : > { %v482_v7 = vrot.slane %v429_v1, 7  ;;  %v496_v8 = vrot.slane %v429_v1, 1  ;;  %v537_v21 = vmul.f32 %v533_v4, %v429_v1 }
 0x11d   : > { %v493_v10 = vsel %vm281_vm1, %v488_v2, %v481_v62  ;;  %v507_v11 = vsel %vm282_vm2, %v502_v3, %v495_v63  ;;  %v492_v12 = vrot.slane %v480_v5, %v487_v45  ;;  %v506_v13 = vrot.slane %v480_v5, %v501_v53 }
 0x11e   : > { %v521_v15 = vmul.f32 %v514_v0, %v493_v10  ;;  %v553_v20 = vmul.f32 %v546_v6, %v507_v11 }
 0x11f   : > { %v494_v17 = vsel %vm281_vm1, %v492_v12, %v482_v7  ;;  %v508_v18 = vsel %vm282_vm2, %v506_v13, %v496_v8 }
 0x120   : > { %v538_v19 = vadd.f32 %v536_v14, %v521_v15  ;;  %v522_v22 = vmul.f32 %v518_v9, %v494_v17  ;;  %v554_v24 = vmul.f32 %v550_v16, %v508_v18 }
 0x122   : > { %v539_v23 = vadd.f32 %v537_v21, %v522_v22  ;;  %v555_v25 = vadd.f32 %v553_v20, %v538_v19 }
 0x124   : > { %v556_v26 = vadd.f32 %v554_v24, %v539_v23 }
 0x126   : > { %v557_v27 = vmul.f32 0.5, %v556_v26 }
 0x128   : > { %961 = vtanh.f32 %v557_v27 }
 0x132   : > { %v962_v28 = vpop.eup %961 }
 0x133   : > { %v559_v29 = vmul.f32 0.5, %v962_v28 }
 0x135   : > { %v560_v30 = vadd.f32 0.5, %v559_v29 }
 0x137   : > { %v561_v31 = vmul.f32 %v560_v30, %v556_v26 }
 0x139   : > { %v562_v32 = vmul.f32 %v561_v31, %v555_v25 }
 0x13b   : > { %v563_v33 = vpack.c.bf16 %v562_v32, %v562_v32 }
 0x13d   : > { %844 = vmatmul.mubr.bf16.vlgmr.msra.gmra.mrb[4].mxu0 %v563_v33 }
 0x210   : > { %v662_v34 = vpop.f32.mrb[4].mxu0 }
 0x211   : > { %668 = vst [vmem:[%s260_s12] sm:$0xff] %v662_v34  ;;  %v845_v35 = vpop.f32.mrb[5].mxu0 }
 0x212   : > { %v665_v36 = vpop.f32.mrb[6].mxu0 }
 0x213   : > { %976 = shalt.err (!%p973_p7)
}
 0x214   : > { %s977_s27 = scalar_lea.hbm %s1269_s14, 128  ;;  %s981_s12 = scalar_lea.hbm %s1325_s5, 512 }
 0x215   : > { %p978_p9 = scmp.ne.s32.totalorder %s1269_s14, %s977_s27  ;;  %p982_p12 = scmp.lt.u32.totalorder %s1269_s14, %s1325_s5 }
 0x216   : > { %p983_p13 = scmp.lt.u32.totalorder %s981_s12, %s977_s27  ;;  %p985_p1 = scmp.lt.u32.totalorder %s977_s27, %s1269_s14 }
 0x217   : > { %p979_p10 = pnand %p978_p9, %p1144_p3 }
 0x218   : > { %p984_p0 = por %p983_p13, %p982_p12 }
 0x219   : > { %p980_p11 = pneg %p979_p10 }
 0x21a   : > { %p986_p2 = por %p985_p1, %p984_p0 }
 0x21c   : > { %p987_p4 = pnand %p986_p2, %p980_p11 }
 0x21e   : > { %990 = shalt.err (!%p987_p4)
}
 0x21f   : > { %847 = dma.vmem_to_hbm [thread:$0]  (%p1144_p3), %s1264_s16, 128, %s1269_s14, %s670_s15   ;;  %v846_v37 = vpop.f32.mrb[7].mxu0 }
 0x220 PF: > { %p853_p5 = scmp.ge.s32.totalorder %s1057_s25, 2  ;;  %s697_s10 = sand.u32 1, %s1029_s18  }
 0x221   : > { %s698_s22 = scalar_lea.sflag [#allocation3], %s697_s10 }
 0x222   : > { %p850_p6 = pnand %p853_p5, %p1153_p8 }
 0x224   : > { %1024 = dma.done.wait (!%p850_p6), %s698_s22, 128  }
 0x225   : > { %1026 = vsyncadd (!%p850_p6), %s698_s22, 4294967168  ;;  %s18_s25 = sadd.s32 1, %s1057_s25   ;;  %s1328_s18 = smov %s1033_s19 }
 0x226   : > { %p15_p7 = scmp.ge.s32.totalorder %s18_s25, 6   ;;  %s1329_s19 = smov %s1037_s20 }
 0x227   : > { %s1330_s20 = smov %s1162_s11  ;;  %s1331_s21 = smov %s1049_s23 }
 0x228   : > { %s1332_s22 = smov %s1053_s24  ;;  %s1333_s23 = smov %s1336_s28 }
 0x229   : > { %s1334_s24 = smov %s1340_s29  ;;  %17 = sbr.rel (!%p15_p7) target bundleno = 5 (0x5), region = 80 }
 0x230   :  { %703 = vsyncpa [#allocation3], 1 }
 0x231   :  { %705 = vsyncpa [#allocation3 + $0x1], 1 }

</bundles_post_ra>
